<compile_context>
chip_gen: v7x
topology: tpu7x:2x2x1
jax: 0.10.0
libtpu: 0.0.40
codegen_flags: <defaults>
</compile_context>

<pallas_src>
import functools

import jax
import jax.numpy as jnp
from jax.experimental import pallas as pl
from jax.experimental.pallas import tpu as pltpu

_MIB = 1024 * 1024


def _round_up(x: int, m: int) -> int:
    return (x + m - 1) // m * m


def _sublane_rows(dtype) -> int:
    # Sub-32-bit dtypes pack along sublanes: keep row tiles dense.
    itemsize = jnp.dtype(dtype).itemsize
    return max(8, 32 // max(itemsize, 1))


@functools.lru_cache(maxsize=1)
def _tpu_vmem_capacity_bytes() -> int:
    try:
        info = pltpu.get_tpu_info()
        cap = int(getattr(info, "vmem_capacity_bytes", 0))
        if cap > 0:
            return cap
    except Exception:
        pass
    # Conservative default (v7x-sized) if the query is unavailable.
    return 64 * _MIB


def _sizing_for_generation():
    """(working_budget_bytes, vmem_limit_bytes, max_tile_b) per VMEM size."""
    cap = _tpu_vmem_capacity_bytes()
    if cap >= 96 * _MIB:
        # v5e / v6e: 128 MiB physical VMEM -> big tiles amortize per-step cost.
        return 64 * _MIB, 100 * _MIB, 8192
    # v7x (64 MiB physical) or unknown: stay conservative.
    return 24 * _MIB, 44 * _MIB, 2048


def _make_triplet_kernel(p: float, eps: float):
    """Builds the Pallas kernel body with hyper-params baked in."""
    p_is_int = float(p).is_integer()

    def _pdist(x, y):
        # Subtract in the wire dtype (bf16-native on v6e/v7x), cast the diff.
        diff = (x - y).astype(jnp.float32)
        if p == 2.0:
            return jnp.sqrt(jnp.sum(diff * diff, axis=-1, keepdims=True))
        if p == 1.0:
            return jnp.sum(jnp.abs(diff), axis=-1, keepdims=True)
        absd = jnp.abs(diff)
        if p_is_int:
            # VPU multiply chain per element; only the per-row root hits EUP.
            acc = absd
            for _ in range(int(p) - 1):
                acc = acc * absd
            s = jnp.sum(acc, axis=-1, keepdims=True)
            return jnp.power(s, 1.0 / p)
        # TODO(synk): non-integer p still lowers jnp.power to exp/log per
        # element (2 EUP transcendentals each) -> EUP-bound for this path.
        s = jnp.sum(jnp.power(absd, p), axis=-1, keepdims=True)
        return jnp.power(s, 1.0 / p)

    def kernel(a_ref, pos_ref, neg_ref, out_ref):
        a = a_ref[...]
        pos = pos_ref[...]
        neg = neg_ref[...]

        # Pairwise p-norm distances along the embedding (lane) axis -> (tile_b, 1).
        d_ap = _pdist(a, pos)
        d_an = _pdist(a, neg)
        d_pn = _pdist(pos, neg)

        # Adaptive margin: exp() is per-row only, EUP never saturates.
        margin_sim = 1.0 + 2.0 / (jnp.exp(4.0 * d_ap) + eps)
        margin_dissim = 1.0 + 2.0 / (jnp.exp(-4.0 * d_an + 4.0) + eps)

        loss = d_ap - (d_an + d_pn) * 0.5 + margin_sim + margin_dissim
        out_ref[...] = jnp.maximum(loss, 0.0)

    return kernel


def _loss_ref_math(anchor, positive, negative, p, eps):
    """Pure-JAX per-row loss (used for the tiny-shape bypass path)."""
    def dist(x1, x2):
        diff = (x1 - x2).astype(jnp.float32)
        return jnp.linalg.norm(diff, ord=p, axis=-1)

    d_ap = dist(anchor, positive)
    d_an = dist(anchor, negative)
    d_pn = dist(positive, negative)
    margin_sim = 1.0 + 2.0 / (jnp.exp(4.0 * d_ap) + eps)
    margin_dissim = 1.0 + 2.0 / (jnp.exp(-4.0 * d_an + 4.0) + eps)
    return jnp.maximum(d_ap - (d_an + d_pn) / 2.0 + margin_sim + margin_dissim, 0.0)


@functools.partial(jax.jit,
                   static_argnames=("p", "eps", "reduction", "use_pallas"))
def adaptive_triplet_margin_loss(anchor, positive, negative,
                                 p: float = 2, eps: float = 1e-6,
                                 reduction: str = "mean",
                                 use_pallas: bool | None = None):
    """Forward pass of AdaptiveTripletMarginLoss.

    bf16 inputs are supported and stream at half the HBM bytes (the kernel
    upcasts the per-pair diff in-register) -- recommended on bandwidth-limited
    parts (v5e especially).
    """
    if reduction not in ("mean", "sum", "none"):
        raise ValueError(f"Invalid reduction mode: {reduction}")
    if anchor.shape != positive.shape or anchor.shape != negative.shape:
        raise ValueError("anchor/positive/negative must share shape (B, D)")

    B, D = anchor.shape
    itemsize = jnp.dtype(anchor.dtype).itemsize

    # Tiny problems: the fixed pallas_call cost dominates, let XLA fuse it.
    if use_pallas is None:
        use_pallas = (3 * B * D) >= (1 << 14)
    if not use_pallas:
        loss = _loss_ref_math(anchor, positive, negative, float(p), float(eps))
        if reduction == "mean":
            return jnp.mean(loss)
        if reduction == "sum":
            return jnp.sum(loss)
        return loss

    sublane = _sublane_rows(anchor.dtype)
    working_budget, vmem_limit, max_tile_b = _sizing_for_generation()

    # Per-row VMEM cost: 3 inputs x 2 pipeline buffers at wire width, plus
    # ~5 live (tile_b, D) f32 intermediates (diffs / partial products / sums).
    per_row_bytes = 3 * 2 * D * itemsize + 5 * D * 4

    if B <= sublane:
        tile_b = B                      # single full-extent block, no raggedness
    else:
        vmem_cap = (working_budget // per_row_bytes) // sublane * sublane
        half_b = _round_up(-(-B // 2), sublane)   # >= 2 grid steps for megacore
        tile_b = max(sublane, min(max_tile_b, half_b, max(vmem_cap, sublane)))
    num_tiles = pl.cdiv(B, tile_b)

    # Advisory cost model for XLA's scheduler.
    flops = 9 * B * D + 24 * B
    if p == 2:
        transcendentals = 5 * B
    elif p == 1:
        transcendentals = 2 * B
    elif float(p).is_integer():
        transcendentals = 8 * B
    else:
        transcendentals = 8 * B + 6 * B * D
    bytes_accessed = 3 * B * D * itemsize + B * 4

    kernel = _make_triplet_kernel(float(p), float(eps))

    per_row_loss = pl.pallas_call(
        kernel,
        out_shape=jax.ShapeDtypeStruct((B, 1), jnp.float32),
        grid=(num_tiles,),
        # Full-extent last dim (== D) is exempt from the 128-lane rule; Mosaic
        # pads lanes internally and the axis=-1 reductions see exactly D cols.
        in_specs=[pl.BlockSpec((tile_b, D), lambda i: (i, 0))] * 3,
        out_specs=pl.BlockSpec((tile_b, 1), lambda i: (i, 0)),
        compiler_params=pltpu.CompilerParams(
            dimension_semantics=("parallel",),
            vmem_limit_bytes=vmem_limit,
        ),
        cost_estimate=pl.CostEstimate(
            flops=int(flops),
            transcendentals=int(transcendentals),
            bytes_accessed=int(bytes_accessed),
        ),
    )(anchor, positive, negative)

    loss = per_row_loss[:, 0]
    if reduction == "mean":
        return jnp.mean(loss)
    if reduction == "sum":
        return jnp.sum(loss)
    return loss


def _reference(anchor, positive, negative, p=2, eps=1e-6, reduction="mean"):
    """Pure-JAX reference mirroring the PyTorch module."""
    loss = _loss_ref_math(anchor, positive, negative, float(p), float(eps))
    if reduction == "mean":
        return loss.mean()
    if reduction == "sum":
        return loss.sum()
    return loss


if __name__ == "__main__":
    key = jax.random.PRNGKey(0)
    k1, k2, k3 = jax.random.split(key, 3)

    # Small shapes consistent with the module: batch=8, embedding_size=32.
    B, D = 8, 32
    anchor = jax.random.normal(k1, (B, D), dtype=jnp.float32)
    positive = jax.random.normal(k2, (B, D), dtype=jnp.float32)
    negative = jax.random.normal(k3, (B, D), dtype=jnp.float32)

    out = jax.block_until_ready(
        adaptive_triplet_margin_loss(anchor, positive, negative,
                                     use_pallas=True))
    ref = _reference(anchor, positive, negative)
    assert jnp.allclose(out, ref, atol=1e-5, rtol=1e-5), (out, ref)

    for red in ("none", "sum"):
        o = jax.block_until_ready(
            adaptive_triplet_margin_loss(anchor, positive, negative,
                                         reduction=red, use_pallas=True))
        r = _reference(anchor, positive, negative, reduction=red)
        assert jnp.allclose(o, r, atol=1e-5, rtol=1e-5), (red, o, r)

    # Ragged shapes: B not a sublane multiple, D not lane-aligned — exercises
    # the unpadded ragged-last-block path and the megacore 2-tile split.
    B2, D2 = 37, 200
    j1, j2, j3 = jax.random.split(jax.random.PRNGKey(1), 3)
    a2 = jax.random.normal(j1, (B2, D2), dtype=jnp.float32)
    p2 = jax.random.normal(j2, (B2, D2), dtype=jnp.float32)
    n2 = jax.random.normal(j3, (B2, D2), dtype=jnp.float32)
    o2 = jax.block_until_ready(
        adaptive_triplet_margin_loss(a2, p2, n2, reduction="none",
                                     use_pallas=True))
    r2 = _reference(a2, p2, n2, reduction="none")
    assert o2.shape == (B2,)
    assert jnp.allclose(o2, r2, atol=1e-5, rtol=1e-5)

    # p=1 fast path and integer p=3 multiply-chain path.
    for pp, tol in ((1, 1e-5), (3, 1e-4)):
        op = jax.block_until_ready(
            adaptive_triplet_margin_loss(a2, p2, n2, p=pp, reduction="none",
                                         use_pallas=True))
        rp = _reference(a2, p2, n2, p=pp, reduction="none")
        assert jnp.allclose(op, rp, atol=tol, rtol=tol), (pp, op, rp)

    print("KERNEL_OK")
</pallas_src>

<mosaic_0001>
module attributes {stable_mosaic.version = 11 : i64} {
  func.func @kernel(%arg0: i32, %arg1: memref<8x32xf32, #tpu.memory_space<vmem>>, %arg2: memref<8x32xf32, #tpu.memory_space<vmem>>, %arg3: memref<8x32xf32, #tpu.memory_space<vmem>>, %arg4: memref<8x1xf32, #tpu.memory_space<vmem>>) attributes {dimension_semantics = [#tpu.dimension_semantics<parallel>], iteration_bounds = array<i64: 1>, scalar_prefetch = 0 : i64, scratch_operands = 0 : i64, tpu.core_type = #tpu.core_type<tc>, window_params = [{transform_indices = @transform_0, window_bounds = array<i64: 8, 32>}, {transform_indices = @transform_1, window_bounds = array<i64: 8, 32>}, {transform_indices = @transform_2, window_bounds = array<i64: 8, 32>}, {transform_indices = @transform_3, window_bounds = array<i64: 8, 1>}]} {
    %c0 = arith.constant 0 : index
    %c0_0 = arith.constant 0 : index
    %0 = vector.load %arg1[%c0, %c0_0] : memref<8x32xf32, #tpu.memory_space<vmem>>, vector<8x32xf32>
    %c0_1 = arith.constant 0 : index
    %c0_2 = arith.constant 0 : index
    %1 = vector.load %arg2[%c0_1, %c0_2] : memref<8x32xf32, #tpu.memory_space<vmem>>, vector<8x32xf32>
    %c0_3 = arith.constant 0 : index
    %c0_4 = arith.constant 0 : index
    %2 = vector.load %arg3[%c0_3, %c0_4] : memref<8x32xf32, #tpu.memory_space<vmem>>, vector<8x32xf32>
    %3 = arith.subf %0, %1 : vector<8x32xf32>
    %4 = arith.mulf %3, %3 : vector<8x32xf32>
    %cst = arith.constant dense<0.000000e+00> : vector<8xf32>
    %5 = vector.multi_reduction <add>, %4, %cst [1] : vector<8x32xf32> to vector<8xf32>
    %6 = vector.shape_cast %5 : vector<8xf32> to vector<8x1xf32>
    %7 = math.sqrt %6 : vector<8x1xf32>
    %8 = arith.subf %0, %2 : vector<8x32xf32>
    %9 = arith.mulf %8, %8 : vector<8x32xf32>
    %cst_5 = arith.constant dense<0.000000e+00> : vector<8xf32>
    %10 = vector.multi_reduction <add>, %9, %cst_5 [1] : vector<8x32xf32> to vector<8xf32>
    %11 = vector.shape_cast %10 : vector<8xf32> to vector<8x1xf32>
    %12 = math.sqrt %11 : vector<8x1xf32>
    %13 = arith.subf %1, %2 : vector<8x32xf32>
    %14 = arith.mulf %13, %13 : vector<8x32xf32>
    %cst_6 = arith.constant dense<0.000000e+00> : vector<8xf32>
    %15 = vector.multi_reduction <add>, %14, %cst_6 [1] : vector<8x32xf32> to vector<8xf32>
    %16 = vector.shape_cast %15 : vector<8xf32> to vector<8x1xf32>
    %17 = math.sqrt %16 : vector<8x1xf32>
    %cst_7 = arith.constant 4.000000e+00 : f32
    %18 = vector.broadcast %cst_7 : f32 to vector<8x1xf32>
    %19 = arith.mulf %18, %7 : vector<8x1xf32>
    %20 = math.exp %19 : vector<8x1xf32>
    %cst_8 = arith.constant 9.99999997E-7 : f32
    %21 = vector.broadcast %cst_8 : f32 to vector<8x1xf32>
    %22 = arith.addf %20, %21 : vector<8x1xf32>
    %cst_9 = arith.constant 2.000000e+00 : f32
    %23 = vector.broadcast %cst_9 : f32 to vector<8x1xf32>
    %24 = arith.divf %23, %22 : vector<8x1xf32>
    %cst_10 = arith.constant 1.000000e+00 : f32
    %25 = vector.broadcast %cst_10 : f32 to vector<8x1xf32>
    %26 = arith.addf %25, %24 : vector<8x1xf32>
    %cst_11 = arith.constant -4.000000e+00 : f32
    %27 = vector.broadcast %cst_11 : f32 to vector<8x1xf32>
    %28 = arith.mulf %27, %12 : vector<8x1xf32>
    %cst_12 = arith.constant 4.000000e+00 : f32
    %29 = vector.broadcast %cst_12 : f32 to vector<8x1xf32>
    %30 = arith.addf %28, %29 : vector<8x1xf32>
    %31 = math.exp %30 : vector<8x1xf32>
    %cst_13 = arith.constant 9.99999997E-7 : f32
    %32 = vector.broadcast %cst_13 : f32 to vector<8x1xf32>
    %33 = arith.addf %31, %32 : vector<8x1xf32>
    %cst_14 = arith.constant 2.000000e+00 : f32
    %34 = vector.broadcast %cst_14 : f32 to vector<8x1xf32>
    %35 = arith.divf %34, %33 : vector<8x1xf32>
    %cst_15 = arith.constant 1.000000e+00 : f32
    %36 = vector.broadcast %cst_15 : f32 to vector<8x1xf32>
    %37 = arith.addf %36, %35 : vector<8x1xf32>
    %38 = arith.addf %12, %17 : vector<8x1xf32>
    %cst_16 = arith.constant 5.000000e-01 : f32
    %39 = vector.broadcast %cst_16 : f32 to vector<8x1xf32>
    %40 = arith.mulf %38, %39 : vector<8x1xf32>
    %41 = arith.subf %7, %40 : vector<8x1xf32>
    %42 = arith.addf %41, %26 : vector<8x1xf32>
    %43 = arith.addf %42, %37 : vector<8x1xf32>
    %cst_17 = arith.constant 0.000000e+00 : f32
    %44 = vector.broadcast %cst_17 : f32 to vector<8x1xf32>
    %45 = arith.maximumf %43, %44 : vector<8x1xf32>
    %c0_18 = arith.constant 0 : index
    %c0_19 = arith.constant 0 : index
    %46 = vector.load %arg4[%c0_18, %c0_19] : memref<8x1xf32, #tpu.memory_space<vmem>>, vector<8x1xf32>
    tpu.vector_store %arg4[%c0_18, %c0_19], %45 {strides = array<i32>} : memref<8x1xf32, #tpu.memory_space<vmem>>, vector<8x1xf32>,
    return
  }
  func.func @transform_0(%arg0: i32) -> (i32, i32) {
    %c0_i32 = arith.constant 0 : i32
    %c0_i32_0 = arith.constant 0 : i32
    return %arg0, %c0_i32 : i32, i32
  }
  func.func @transform_1(%arg0: i32) -> (i32, i32) {
    %c0_i32 = arith.constant 0 : i32
    %c0_i32_0 = arith.constant 0 : i32
    return %arg0, %c0_i32 : i32, i32
  }
  func.func @transform_2(%arg0: i32) -> (i32, i32) {
    %c0_i32 = arith.constant 0 : i32
    %c0_i32_0 = arith.constant 0 : i32
    return %arg0, %c0_i32 : i32, i32
  }
  func.func @transform_3(%arg0: i32) -> (i32, i32) {
    %c0_i32 = arith.constant 0 : i32
    %c0_i32_0 = arith.constant 0 : i32
    return %arg0, %c0_i32 : i32, i32
  }
}

</mosaic_0001>

<bundles_post_ra>
// kernel: adaptive_triplet_margin_loss.1
= control target key start
LH: loop header
LB: loop body
LE: loop exit
PB: predicated region body
PF: predicated region fallthrough
CT: control target
= control target key end

     0   :  { %8 = vsyncpa [#allocation3], 0  ;;  %s267_s0 = inlined_call_operand.hbm [shape: f32[8,32], index: 0, kind: input, shape index: {}]   ;;  %s268_s1 = inlined_call_operand.hbm [shape: f32[8,32], index: 1, kind: input, shape index: {}]   ;;  %s269_s2 = inlined_call_operand.hbm [shape: f32[8,32], index: 2, kind: input, shape index: {}]   ;;  %s270_s3 = inlined_call_operand.vmem [shape: f32[8,1], index: 3, kind: output, shape index: {}]  }
   0x1   :  { %9 = vsyncpa [#allocation5], 0  ;;  %s205_s12 = smov [#allocation4]   ;;  %s206_s14 = smov [#allocation2]  }
   0x2   :  { %s26_s13 = sshll.u32 %s205_s12, 4  ;;  %s16_s15 = sshll.u32 %s206_s14, 4  ;;  %s27_s13 = int_to_ptr.vmem [resolvable:$true] %s26_s13  ;;  %s17_s15 = int_to_ptr.vmem [resolvable:$true] %s16_s15 }
   0x3   :  { %s135_s18 = scalar_lea.hbm %s268_s1, 128 }
   0x4   :  { %p136_p0 = scmp.ne.s32.totalorder %s268_s1, %s135_s18  ;;  %p139_p1 = scmp.lt.u32.totalorder %s135_s18, %s268_s1 }
   0x6   :  { %p141_p2 = pnand %p139_p1, %p136_p0 }
   0x8   :  { %144 = shalt.err (!%p141_p2)
}
   0x9   :  { %s145_s23 = scalar_lea.vmem %s27_s13, 128  ;;  %p150_p4 = scmp.lt.s32.totalorder %s27_s13, %s27_s13 }
   0xa   :  { %p146_p3 = scmp.ne.s32.totalorder %s27_s13, %s145_s23  ;;  %p151_p5 = scmp.lt.s32.totalorder %s145_s23, %s145_s23 }
   0xc   :  { %p152_p6 = por %p151_p5, %p150_p4 }
   0xe   :  { %p153_p7 = pnand %p152_p6, %p146_p3 }
  0x10   :  { %156 = shalt.err (!%p153_p7)
}
  0x11   :  { %29 = dma.hbm_to_vmem [thread:$0]  %s268_s1, 128, %s27_s13, [#allocation5]  }
  0x12   :  { %s157_s28 = scalar_lea.hbm %s267_s0, 128 }
  0x13   :  { %p158_p8 = scmp.ne.s32.totalorder %s267_s0, %s157_s28  ;;  %p161_p9 = scmp.lt.u32.totalorder %s157_s28, %s267_s0 }
  0x15   :  { %p163_p10 = pnand %p161_p9, %p158_p8 }
  0x17   :  { %166 = shalt.err (!%p163_p10)
}
  0x18   :  { %s167_s6 = scalar_lea.vmem %s17_s15, 128  ;;  %p172_p12 = scmp.lt.s32.totalorder %s17_s15, %s17_s15 }
  0x19   :  { %p168_p11 = scmp.ne.s32.totalorder %s17_s15, %s167_s6  ;;  %p173_p13 = scmp.lt.s32.totalorder %s167_s6, %s167_s6 }
  0x1b   :  { %p174_p0 = por %p173_p13, %p172_p12 }
  0x1d   :  { %p175_p1 = pnand %p174_p0, %p168_p11 }
  0x1f   :  { %178 = shalt.err (!%p175_p1)
}
  0x20   :  { %19 = dma.hbm_to_vmem [thread:$0]  %s267_s0, 128, %s17_s15, [#allocation3]  }
  0x21   :  { %s207_s8 = smov [#allocation6]   ;;  %s179_s12 = scalar_lea.hbm %s269_s2, 128 }
  0x22   :  { %s36_s9 = sshll.u32 %s207_s8, 4  ;;  %p180_p2 = scmp.ne.s32.totalorder %s269_s2, %s179_s12  ;;  %s37_s9 = int_to_ptr.vmem [resolvable:$true] %s36_s9 }
  0x23   :  { %p183_p3 = scmp.lt.u32.totalorder %s179_s12, %s269_s2 }
  0x25   :  { %p185_p4 = pnand %p183_p3, %p180_p2 }
  0x27   :  { %188 = shalt.err (!%p185_p4)
}
  0x28   :  { %s189_s18 = scalar_lea.vmem %s37_s9, 128  ;;  %p194_p6 = scmp.lt.s32.totalorder %s37_s9, %s37_s9 }
  0x29   :  { %p190_p5 = scmp.ne.s32.totalorder %s37_s9, %s189_s18  ;;  %p195_p7 = scmp.lt.s32.totalorder %s189_s18, %s189_s18 }
  0x2b   :  { %p196_p8 = por %p195_p7, %p194_p6 }
  0x2d   :  { %p197_p9 = pnand %p196_p8, %p190_p5 }
  0x2f   :  { %200 = shalt.err (!%p197_p9)
}
  0x30   :  { %39 = dma.hbm_to_vmem [thread:$0]  %s269_s2, 128, %s37_s9, [#allocation5]  }
  0x31   :  { %201 = dma.done.wait [#allocation3], 128  }
  0x32   :  { %202 = vsyncadd [#allocation3], 4294967168 }
  0x33   :  { %203 = dma.done.wait [#allocation5], 256  }
  0x34   :  { %204 = vsyncadd [#allocation5], 4294967040  ;;  %v49_v0 = vld [vmem:[#allocation2] sm:$0xff]  ;;  %v50_v1 = vld [vmem:[#allocation4] sm:$0xff]  ;;  %vm54_vm0 = vcmask 261120   ;;  %vm110_vm7 = vcmask 7168  }
  0x35   :  { %v51_v2 = vld [vmem:[#allocation6] sm:$0xff]  ;;  %v52_v3 = vsub.f32 %v49_v0, %v50_v1 }
  0x36   :  { %v77_v4 = vsub.f32 %v50_v1, %v51_v2  ;;  %v65_v5 = vsub.f32 %v49_v0, %v51_v2 }
  0x37   :  { %v53_v6 = vmul.f32 %v52_v3, %v52_v3 }
  0x38   :  { %v78_v7 = vmul.f32 %v77_v4, %v77_v4  ;;  %v66_v8 = vmul.f32 %v65_v5, %v65_v5 }
  0x39   :  { %v55_v9 = vsel %vm54_vm0, %v53_v6, 0.0 }
  0x3a   :  { %v79_v10 = vsel %vm54_vm0, %v78_v7, 0.0  ;;  %56 = vadd.xlane.f32.xlu0 %v55_v9  ;;  %v67_v11 = vsel %vm54_vm0, %v66_v8, 0.0 }
  0x3b   :  { %80 = vadd.xlane.f32.xlu1 %v79_v10 }
  0x3e   :  { %68 = vadd.xlane.f32.xlu0 %v67_v11 }
  0xc7   :  { %v57_v12 = vpop.xlane.xlu0 %56 }
  0xc8   :  { %121 = vrsqrt.f32 %v57_v12  ;;  %vm60_vm1 = vcmp.eq.f32.partialorder %v57_v12, inf  ;;  %v63_v16 = vand.u32 2147483648, %v57_v12  ;;  %vm62_vm2 = vcmp.eq.f32.partialorder %v57_v12, 0.0  ;;  %v81_v21 = vpop.xlane.xlu1 %80 }
  0xc9   :  { %vm84_vm5 = vcmp.eq.f32.partialorder %v81_v21, inf  ;;  %v87_v34 = vand.u32 2147483648, %v81_v21  ;;  %vm86_vm6 = vcmp.eq.f32.partialorder %v81_v21, 0.0 }
  0xcb   :  { %v69_v13 = vpop.xlane.xlu0 %68 }
  0xcc   :  { %123 = vrsqrt.f32 %v69_v13  ;;  %vm72_vm3 = vcmp.eq.f32.partialorder %v69_v13, inf  ;;  %v75_v23 = vand.u32 2147483648, %v69_v13  ;;  %vm74_vm4 = vcmp.eq.f32.partialorder %v69_v13, 0.0 }
  0xcd   :  { %125 = vrsqrt.f32 %v81_v21 }
  0xd2   :  { %v122_v14 = vpop.eup %121 }
  0xd3   :  { %v59_v15 = vmul.f32 %v122_v14, %v57_v12 }
  0xd5   :  { %v61_v17 = vsel %vm60_vm1, %v57_v12, %v59_v15 }
  0xd6   :  { %v124_v18 = vpop.eup %123  ;;  %v64_v19 = vsel %vm62_vm2, %v63_v16, %v61_v17 }
  0xd7   :  { %v89_v20 = vmul.f32 4.0, %v64_v19  ;;  %v71_v22 = vmul.f32 %v124_v18, %v69_v13  ;;  %v126_v30 = vpop.eup %125 }
  0xd8   :  { %v83_v33 = vmul.f32 %v126_v30, %v81_v21 }
  0xd9   :  { %v90_v24 = vmul.f32 1.442695, %v89_v20  ;;  %v73_v25 = vsel %vm72_vm3, %v69_v13, %v71_v22 }
  0xda   :  { %v76_v26 = vsel %vm74_vm4, %v75_v23, %v73_v25  ;;  %v85_v36 = vsel %vm84_vm5, %v81_v21, %v83_v33 }
  0xdb   :  { %127 = vpow2.f32 %v90_v24  ;;  %v96_v27 = vmul.f32 -4.0, %v76_v26  ;;  %v88_v38 = vsel %vm86_vm6, %v87_v34, %v85_v36 }
  0xdc   :  { %v104_v39 = vadd.f32 %v88_v38, %v76_v26 }
  0xdd   :  { %v97_v28 = vadd.f32 4.0, %v96_v27 }
  0xde   :  { %v105_v42 = vmul.f32 0.5, %v104_v39 }
  0xdf   :  { %v98_v29 = vmul.f32 1.442695, %v97_v28 }
  0xe0   :  { %v106_v46 = vsub.f32 %v64_v19, %v105_v42 }
  0xe1   :  { %129 = vpow2.f32 %v98_v29 }
  0xe5   :  { %v128_v31 = vpop.eup %127 }
  0xe6   :  { %v92_v32 = vadd.f32 1e-06, %v128_v31 }
  0xe8   :  { %131 = vrcp.f32 %v92_v32 }
  0xeb   :  { %v130_v35 = vpop.eup %129 }
  0xec   :  { %v100_v37 = vadd.f32 1e-06, %v130_v35 }
  0xee   :  { %133 = vrcp.f32 %v100_v37 }
  0xf2   :  { %v132_v40 = vpop.eup %131 }
  0xf3   :  { %v94_v41 = vmul.f32 2.0, %v132_v40 }
  0xf5   :  { %v95_v43 = vadd.f32 1.0, %v94_v41 }
  0xf7   :  { %v107_v48 = vadd.f32 %v106_v46, %v95_v43 }
  0xf8   :  { %v134_v44 = vpop.eup %133 }
  0xf9   :  { %v102_v45 = vmul.f32 2.0, %v134_v44 }
  0xfb   :  { %v103_v47 = vadd.f32 1.0, %v102_v45 }
  0xfd   :  { %v108_v49 = vadd.f32 %v107_v48, %v103_v47 }
  0xff   :  { %v109_v50 = vmax.f32 %v108_v49, 0.0 }
 0x101   :  { %111 = vst.msk [vmem:[%s270_s3] sm:$0xff] %vm110_vm7, %v109_v50 }
 0x102   :  { %116 = vsyncpa [#allocation3], 1 }
 0x103   :  { %117 = vsyncpa [#allocation5], 1 }

</bundles_post_ra>
